<compile_context>
chip_gen: v6e
topology: v6e:2x2x1
jax: 0.10.0
libtpu: 0.0.40
codegen_flags: <defaults>
</compile_context>

<pallas_src>
import itertools

import numpy as np
import jax
import jax.numpy as jnp
from jax import lax
from jax.experimental import pallas as pl
from jax.experimental.pallas import tpu as pltpu

LANE = 128
SUBLANE = 8


def _round_up(x, m):
    return ((x + m - 1) // m) * m


# --------------------------------------------------------------------------
# Pallas kernel: per-(batch, point-tile) accumulation of the matching cost
# --------------------------------------------------------------------------
def make_matcher_kernel(w_class: float, w_bce: float, w_dice: float, num_points: int):
    inv_p = w_bce / float(num_points)   # fold w_bce and the 1/num_points mean

    def _recip(d):
        # EUP approximate reciprocal seed + one Newton refinement (VPU).
        r = pl.reciprocal(d, approx=True)
        return r * (2.0 - d * r)

    def _mm_nt(a, b):
        # [Q, K] x [M, K] -> [Q, M]; contraction on the last dim of both (MXU),
        # no explicit transpose / relayout.
        return lax.dot_general(a, b, (((1,), (1,)), ((), ())),
                               preferred_element_type=jnp.float32)

    def kernel(cls_ref, oh_ref, x_ref, t_ref, cost_ref,
               acc_qm, acc_st, acc_sp, acc_s, acc_t):
        k = pl.program_id(1)

        @pl.when(k == 0)
        def _init():
            # ---- class cost (runs once per batch element): -prob @ onehot^T ----
            logits = cls_ref[0]                                   # [Qp, Cp]
            logits = logits - jnp.max(logits, axis=-1, keepdims=True)
            e = jnp.exp(logits)                                   # padded lanes -> 0
            prob = e * _recip(jnp.sum(e, axis=-1, keepdims=True))
            acc_qm[...] = -w_class * _mm_nt(prob, oh_ref[0])      # [Qp, Mp]
            acc_st[...] = jnp.zeros_like(acc_st)
            acc_sp[...] = jnp.zeros_like(acc_sp)
            acc_s[...] = jnp.zeros_like(acc_s)
            acc_t[...] = jnp.zeros_like(acc_t)

        x = x_ref[0]                                              # [Qp, Pt]
        t = t_ref[0]                                              # [Mp, Pt]

        # stable softplus / sigmoid sharing transcendentals
        log1pexp = jnp.log1p(jnp.exp(-jnp.abs(x)))
        sp_x = jnp.maximum(x, 0.0) + log1pexp                     # softplus(x)
        s = jnp.exp(x - sp_x)                                     # sigmoid(x)

        # BCE (softplus - x*t identity) and dice numerator: two MXU matmuls
        acc_qm[...] += (-inv_p) * _mm_nt(x, t)                    # -w_bce/P * x@t^T
        acc_st[...] += _mm_nt(s, t)                               # sigmoid(x)@t^T
        # per-row point sums on the XLU (idle slot here)
        acc_sp[...] += jnp.sum(sp_x, axis=-1, keepdims=True)      # [Qp, 1]
        acc_s[...] += jnp.sum(s, axis=-1, keepdims=True)          # [Qp, 1]
        acc_t[...] += jnp.sum(t, axis=-1, keepdims=True)          # [Mp, 1]

        @pl.when(k == pl.num_programs(1) - 1)
        def _finalize():
            qp = acc_s.shape[0]
            # broadcast sum_t ([Mp,1]) across queries with a K=1 dot_general
            # (avoids a lane<->sublane relayout of a transposed vector).
            t_row = lax.dot_general(jnp.ones((qp, 1), jnp.float32), acc_t[...],
                                    (((1,), (1,)), ((), ())),
                                    preferred_element_type=jnp.float32)  # [Qp, Mp]
            denom = acc_s[...] + t_row + 1.0
            cost_dice = 1.0 - (2.0 * acc_st[...] + 1.0) * _recip(denom)
            cost = acc_qm[...] + inv_p * acc_sp[...] + w_dice * cost_dice
            cost_ref[0] = cost.astype(cost_ref.dtype)

    return kernel


# --------------------------------------------------------------------------
# XLA-side 4-tap bilinear point sampling (grid_sample, align_corners=False,
# zero padding) -- O(P) gather, replaces the dense [HW, P] weight matrix.
# --------------------------------------------------------------------------
def point_sample(masks, coords):
    # masks: [N, H, W], coords: [P, 2] in [0, 1], order (x, y)
    N, H, W = masks.shape
    gx = coords[:, 0] * 2.0 - 1.0
    gy = coords[:, 1] * 2.0 - 1.0
    fx = ((gx + 1.0) * W - 1.0) / 2.0
    fy = ((gy + 1.0) * H - 1.0) / 2.0
    x0 = jnp.floor(fx); y0 = jnp.floor(fy)
    x1 = x0 + 1.0; y1 = y0 + 1.0
    wx1 = fx - x0; wx0 = 1.0 - wx1
    wy1 = fy - y0; wy0 = 1.0 - wy1

    def gather(ix, iy):
        valid = ((ix >= 0) & (ix <= W - 1) & (iy >= 0) & (iy <= H - 1)).astype(masks.dtype)
        ixc = jnp.clip(ix, 0, W - 1).astype(jnp.int32)
        iyc = jnp.clip(iy, 0, H - 1).astype(jnp.int32)
        return masks[:, iyc, ixc] * valid[None, :]

    return (gather(x0, y0) * (wx0 * wy0)[None, :]
            + gather(x1, y0) * (wx1 * wy0)[None, :]
            + gather(x0, y1) * (wx0 * wy1)[None, :]
            + gather(x1, y1) * (wx1 * wy1)[None, :])


def point_sample_batch(masks, coords):
    return jax.vmap(point_sample)(masks, coords)


# --------------------------------------------------------------------------
# Wrapper: sampling + padding + (batch, point) grid + pallas_call
# --------------------------------------------------------------------------
def compute_cost_matrices(class_logits, gt_classes, mask_logits, gt_masks,
                          point_coords, w_class=1.0, w_bce=1.0, w_dice=1.0,
                          point_tile=2048):
    f32 = jnp.float32
    B, Q, C = class_logits.shape
    M = gt_classes.shape[1]
    P = point_coords.shape[1]
    # TODO(synk): support num_points not a multiple of 128 (needs a point mask
    # on sp_x / s / t inside the reduction); Mask2Former's P=12544 is fine.
    assert P % LANE == 0, "num_points must be a multiple of 128"

    Qp = _round_up(Q, SUBLANE)
    Mp = _round_up(max(M, LANE), LANE)          # lane-dense output (unmasked vst)
    Cp = _round_up(max(C, LANE), LANE)

    # ---- point sampling outside the kernel (4-tap gather in XLA) ----
    x_pts = point_sample_batch(mask_logits.astype(f32), point_coords)   # [B, Q, P]
    t_pts = point_sample_batch(gt_masks.astype(f32), point_coords)      # [B, M, P]

    # ---- pad inputs ----
    cls_p = jnp.pad(class_logits.astype(f32),
                    ((0, 0), (0, Qp - Q), (0, Cp - C)),
                    constant_values=-1e30)                     # padded classes -> prob 0
    onehot = jax.nn.one_hot(gt_classes, Cp, dtype=f32)         # [B, M, Cp]
    onehot = jnp.pad(onehot, ((0, 0), (0, Mp - M), (0, 0)))
    x_p = jnp.pad(x_pts, ((0, 0), (0, Qp - Q), (0, 0)))
    t_p = jnp.pad(t_pts, ((0, 0), (0, Mp - M), (0, 0)))

    # ---- point-reduction tile: largest 128-multiple divisor of P <= point_tile ----
    pt = LANE
    for d in range(max(point_tile // LANE, 1), 0, -1):
        if (P // LANE) % d == 0:
            pt = d * LANE
            break
    nk = P // pt

    kernel = make_matcher_kernel(float(w_class), float(w_bce), float(w_dice), P)

    # ---- scoped-VMEM limit from the per-step block footprint (double-buffered) ----
    blk_bytes = 4 * (Qp * Cp + Mp * Cp + Qp * pt + Mp * pt)
    out_bytes = 4 * Qp * Mp
    scratch_bytes = 4 * (2 * Qp * Mp + 2 * Qp + Mp)
    vmem_bytes = int(min(max(2 * (blk_bytes + out_bytes) + scratch_bytes + (4 << 20),
                             32 << 20), 48 << 20))

    cost = pl.pallas_call(
        kernel,
        out_shape=jax.ShapeDtypeStruct((B, Qp, Mp), f32),
        grid_spec=pltpu.PrefetchScalarGridSpec(
            num_scalar_prefetch=0,
            grid=(B, nk),                       # batch parallel, points = reduction
            in_specs=[
                pl.BlockSpec((1, Qp, Cp), lambda b, k: (b, 0, 0)),
                pl.BlockSpec((1, Mp, Cp), lambda b, k: (b, 0, 0)),
                pl.BlockSpec((1, Qp, pt), lambda b, k: (b, 0, k)),
                pl.BlockSpec((1, Mp, pt), lambda b, k: (b, 0, k)),
            ],
            out_specs=pl.BlockSpec((1, Qp, Mp), lambda b, k: (b, 0, 0)),
            scratch_shapes=[
                pltpu.VMEM((Qp, Mp), jnp.float32),   # class + BCE accumulator
                pltpu.VMEM((Qp, Mp), jnp.float32),   # sigmoid(x) @ t^T
                pltpu.VMEM((Qp, 1), jnp.float32),    # sum_p softplus(x)
                pltpu.VMEM((Qp, 1), jnp.float32),    # sum_p sigmoid(x)
                pltpu.VMEM((Mp, 1), jnp.float32),    # sum_p t
            ],
        ),
        compiler_params=pltpu.CompilerParams(
            dimension_semantics=("parallel", "arbitrary"),
            vmem_limit_bytes=vmem_bytes),
    )(cls_p, onehot, x_p, t_p)
    return cost[:, :Q, :M]


# --------------------------------------------------------------------------
# Pure-JAX reference cost (matches the PyTorch module) — verification
# --------------------------------------------------------------------------
def reference_cost(class_logits, gt_onehot, q_pts, t_pts, wc=1.0, wb=1.0, wd=1.0):
    prob = jax.nn.softmax(class_logits, axis=-1)
    cost_class = -jnp.einsum('bqc,bmc->bqm', prob, gt_onehot)
    x, t = q_pts, t_pts
    P = x.shape[-1]
    pos = jnp.logaddexp(0.0, -x)
    neg = jnp.logaddexp(0.0, x)
    cost_bce = (jnp.einsum('bqp,bmp->bqm', pos, t)
                + jnp.einsum('bqp,bmp->bqm', neg, 1.0 - t)) / P
    s = jax.nn.sigmoid(x)
    numer = 2.0 * jnp.einsum('bqp,bmp->bqm', s, t)
    denom = s.sum(-1)[:, :, None] + t.sum(-1)[:, None, :]
    cost_dice = 1.0 - (numer + 1.0) / (denom + 1.0)
    return wc * cost_class + wb * cost_bce + wd * cost_dice


# --------------------------------------------------------------------------
# Host-side assignment (no Pallas equivalent; exact brute force for small M)
# TODO(synk): use scipy.optimize.linear_sum_assignment for large Q/M.
# --------------------------------------------------------------------------
def linear_sum_assignment_bruteforce(cost):
    Q, M = cost.shape
    assert Q >= M
    best_rows, best_cost = None, np.inf
    for rows in itertools.permutations(range(Q), M):
        c = sum(cost[rows[j], j] for j in range(M))
        if c < best_cost:
            best_cost, best_rows = c, rows
    row_ind = np.asarray(best_rows, dtype=np.int64)
    col_ind = np.arange(M, dtype=np.int64)
    order = np.argsort(row_ind)
    return row_ind[order], col_ind[order]


if __name__ == "__main__":
    B, Q, C, M, H, W, P = 2, 8, 8, 4, 16, 16, 128   # num_points = P = 128

    key = jax.random.PRNGKey(0)
    k1, k2, k3, k4, k5 = jax.random.split(key, 5)
    class_logits = jax.random.normal(k1, (B, Q, C), dtype=jnp.float32)
    mask_logits = jax.random.normal(k2, (B, Q, H, W), dtype=jnp.float32)
    gt_classes = jax.random.randint(k3, (B, M), 0, C, dtype=jnp.int32)
    gt_masks = jax.random.bernoulli(k4, 0.5, (B, M, H, W)).astype(jnp.float32)
    # torch.rand point coords per batch element -> deterministic jax.random here
    point_coords = jax.random.uniform(k5, (B, P, 2), dtype=jnp.float32)

    cost = compute_cost_matrices(class_logits, gt_classes, mask_logits, gt_masks,
                                 point_coords, w_class=1.0, w_bce=1.0, w_dice=1.0)
    cost = jax.block_until_ready(cost)

    # reference path: same sampled points, plain-JAX cost math
    q_pts = point_sample_batch(mask_logits, point_coords)           # [B, Q, P]
    t_pts = point_sample_batch(gt_masks, point_coords)              # [B, M, P]
    gt_onehot = jax.nn.one_hot(gt_classes, C, dtype=jnp.float32)    # [B, M, C]
    ref = reference_cost(class_logits, gt_onehot, q_pts, t_pts)
    np.testing.assert_allclose(np.asarray(cost), np.asarray(ref), rtol=2e-5, atol=2e-5)

    cost_np = np.asarray(cost)
    indices = [linear_sum_assignment_bruteforce(cost_np[b]) for b in range(B)]
    assert all(len(i) == len(j) == min(Q, M) for i, j in indices)

    print("KERNEL_OK")
</pallas_src>

<mosaic_0001>
module attributes {stable_mosaic.version = 11 : i64} {
  func.func @kernel(%arg0: i32, %arg1: i32, %arg2: memref<1x8x128xf32, #tpu.memory_space<vmem>>, %arg3: memref<1x128x128xf32, #tpu.memory_space<vmem>>, %arg4: memref<1x8x128xf32, #tpu.memory_space<vmem>>, %arg5: memref<1x128x128xf32, #tpu.memory_space<vmem>>, %arg6: memref<1x8x128xf32, #tpu.memory_space<vmem>>, %arg7: memref<8x128xf32, #tpu.memory_space<vmem>>, %arg8: memref<8x128xf32, #tpu.memory_space<vmem>>, %arg9: memref<8x1xf32, #tpu.memory_space<vmem>>, %arg10: memref<8x1xf32, #tpu.memory_space<vmem>>, %arg11: memref<128x1xf32, #tpu.memory_space<vmem>>) attributes {dimension_semantics = [#tpu.dimension_semantics<parallel>, #tpu.dimension_semantics<arbitrary>], iteration_bounds = array<i64: 2, 1>, scalar_prefetch = 0 : i64, scratch_operands = 5 : i64, tpu.core_type = #tpu.core_type<tc>, window_params = [{transform_indices = @transform_0, window_bounds = array<i64: 1, 8, 128>}, {transform_indices = @transform_1, window_bounds = array<i64: 1, 128, 128>}, {transform_indices = @transform_2, window_bounds = array<i64: 1, 8, 128>}, {transform_indices = @transform_3, window_bounds = array<i64: 1, 128, 128>}, {transform_indices = @transform_4, window_bounds = array<i64: 1, 8, 128>}]} {
    %c0_i32 = arith.constant 0 : i32
    %0 = arith.cmpi eq, %arg1, %c0_i32 : i32
    %1 = arith.extui %0 : i1 to i32
    %c0_i32_0 = arith.constant 0 : i32
    %2 = arith.cmpi ne, %1, %c0_i32_0 : i32
    scf.if %2 {
      %c0_35 = arith.constant 0 : index
      %c0_36 = arith.constant 0 : index
      %c0_37 = arith.constant 0 : index
      %45 = vector.load %arg2[%c0_35, %c0_36, %c0_37] : memref<1x8x128xf32, #tpu.memory_space<vmem>>, vector<1x8x128xf32>
      %46 = vector.shape_cast %45 : vector<1x8x128xf32> to vector<8x128xf32>
      %cst_38 = arith.constant dense<0xFF800000> : vector<8xf32>
      %47 = vector.multi_reduction <maximumf>, %46, %cst_38 [1] : vector<8x128xf32> to vector<8xf32>
      %48 = vector.shape_cast %47 : vector<8xf32> to vector<8x1xf32>
      %49 = vector.broadcast %48 : vector<8x1xf32> to vector<8x128xf32>
      %50 = arith.subf %46, %49 : vector<8x128xf32>
      %51 = math.exp %50 : vector<8x128xf32>
      %cst_39 = arith.constant dense<0.000000e+00> : vector<8xf32>
      %52 = vector.multi_reduction <add>, %51, %cst_39 [1] : vector<8x128xf32> to vector<8xf32>
      %53 = vector.shape_cast %52 : vector<8xf32> to vector<8x1xf32>
      %54 = tpu.reciprocal %53 {approx = true} : vector<8x1xf32> -> vector<8x1xf32>
      %55 = arith.mulf %53, %54 : vector<8x1xf32>
      %cst_40 = arith.constant 2.000000e+00 : f32
      %56 = vector.broadcast %cst_40 : f32 to vector<8x1xf32>
      %57 = arith.subf %56, %55 : vector<8x1xf32>
      %58 = arith.mulf %54, %57 : vector<8x1xf32>
      %59 = vector.broadcast %58 : vector<8x1xf32> to vector<8x128xf32>
      %60 = arith.mulf %51, %59 : vector<8x128xf32>
      %c0_41 = arith.constant 0 : index
      %c0_42 = arith.constant 0 : index
      %c0_43 = arith.constant 0 : index
      %61 = vector.load %arg3[%c0_41, %c0_42, %c0_43] : memref<1x128x128xf32, #tpu.memory_space<vmem>>, vector<1x128x128xf32>
      %62 = vector.shape_cast %61 : vector<1x128x128xf32> to vector<128x128xf32>
      %cst_44 = arith.constant dense<0.000000e+00> : vector<8x128xf32>
      %63 = tpu.matmul %60, %62, %cst_44 {dimension_numbers = #tpu.dot_dimension_numbers<[1], [1], [0], [0], [0, 0, 1, 0], [], []>} : vector<8x128xf32>, vector<128x128xf32>, vector<8x128xf32> -> vector<8x128xf32>
      %cst_45 = arith.constant -1.000000e+00 : f32
      %64 = vector.broadcast %cst_45 : f32 to vector<8x128xf32>
      %65 = arith.mulf %64, %63 : vector<8x128xf32>
      %c0_46 = arith.constant 0 : index
      %c0_47 = arith.constant 0 : index
      %66 = vector.load %arg7[%c0_46, %c0_47] : memref<8x128xf32, #tpu.memory_space<vmem>>, vector<8x128xf32>
      tpu.vector_store %arg7[%c0_46, %c0_47], %65 {strides = array<i32>} : memref<8x128xf32, #tpu.memory_space<vmem>>, vector<8x128xf32>,
      %cst_48 = arith.constant 0.000000e+00 : f32
      %67 = vector.broadcast %cst_48 : f32 to vector<8x128xf32>
      %c0_49 = arith.constant 0 : index
      %c0_50 = arith.constant 0 : index
      %68 = vector.load %arg8[%c0_49, %c0_50] : memref<8x128xf32, #tpu.memory_space<vmem>>, vector<8x128xf32>
      tpu.vector_store %arg8[%c0_49, %c0_50], %67 {strides = array<i32>} : memref<8x128xf32, #tpu.memory_space<vmem>>, vector<8x128xf32>,
      %cst_51 = arith.constant 0.000000e+00 : f32
      %69 = vector.broadcast %cst_51 : f32 to vector<8x1xf32>
      %c0_52 = arith.constant 0 : index
      %c0_53 = arith.constant 0 : index
      %70 = vector.load %arg9[%c0_52, %c0_53] : memref<8x1xf32, #tpu.memory_space<vmem>>, vector<8x1xf32>
      tpu.vector_store %arg9[%c0_52, %c0_53], %69 {strides = array<i32>} : memref<8x1xf32, #tpu.memory_space<vmem>>, vector<8x1xf32>,
      %cst_54 = arith.constant 0.000000e+00 : f32
      %71 = vector.broadcast %cst_54 : f32 to vector<8x1xf32>
      %c0_55 = arith.constant 0 : index
      %c0_56 = arith.constant 0 : index
      %72 = vector.load %arg10[%c0_55, %c0_56] : memref<8x1xf32, #tpu.memory_space<vmem>>, vector<8x1xf32>
      tpu.vector_store %arg10[%c0_55, %c0_56], %71 {strides = array<i32>} : memref<8x1xf32, #tpu.memory_space<vmem>>, vector<8x1xf32>,
      %cst_57 = arith.constant 0.000000e+00 : f32
      %73 = vector.broadcast %cst_57 : f32 to vector<128x1xf32>
      %c0_58 = arith.constant 0 : index
      %c0_59 = arith.constant 0 : index
      %74 = vector.load %arg11[%c0_58, %c0_59] : memref<128x1xf32, #tpu.memory_space<vmem>>, vector<128x1xf32>
      tpu.vector_store %arg11[%c0_58, %c0_59], %73 {strides = array<i32>} : memref<128x1xf32, #tpu.memory_space<vmem>>, vector<128x1xf32>,
    } else {
    }
    %c0 = arith.constant 0 : index
    %c0_1 = arith.constant 0 : index
    %c0_2 = arith.constant 0 : index
    %3 = vector.load %arg4[%c0, %c0_1, %c0_2] : memref<1x8x128xf32, #tpu.memory_space<vmem>>, vector<1x8x128xf32>
    %4 = vector.shape_cast %3 : vector<1x8x128xf32> to vector<8x128xf32>
    %c0_3 = arith.constant 0 : index
    %c0_4 = arith.constant 0 : index
    %c0_5 = arith.constant 0 : index
    %5 = vector.load %arg5[%c0_3, %c0_4, %c0_5] : memref<1x128x128xf32, #tpu.memory_space<vmem>>, vector<1x128x128xf32>
    %6 = vector.shape_cast %5 : vector<1x128x128xf32> to vector<128x128xf32>
    %7 = math.absf %4 : vector<8x128xf32>
    %cst = arith.constant 0.000000e+00 : f32
    %8 = vector.broadcast %cst : f32 to vector<8x128xf32>
    %9 = arith.subf %8, %7 : vector<8x128xf32>
    %10 = math.exp %9 : vector<8x128xf32>
    %11 = math.log1p %10 : vector<8x128xf32>
    %cst_6 = arith.constant 0.000000e+00 : f32
    %12 = vector.broadcast %cst_6 : f32 to vector<8x128xf32>
    %13 = arith.maximumf %4, %12 : vector<8x128xf32>
    %14 = arith.addf %13, %11 : vector<8x128xf32>
    %15 = arith.subf %4, %14 : vector<8x128xf32>
    %16 = math.exp %15 : vector<8x128xf32>
    %c0_7 = arith.constant 0 : index
    %c0_8 = arith.constant 0 : index
    %17 = vector.load %arg7[%c0_7, %c0_8] : memref<8x128xf32, #tpu.memory_space<vmem>>, vector<8x128xf32>
    %cst_9 = arith.constant dense<0.000000e+00> : vector<8x128xf32>
    %18 = tpu.matmul %4, %6, %cst_9 {dimension_numbers = #tpu.dot_dimension_numbers<[1], [1], [0], [0], [0, 0, 1, 0], [], []>} : vector<8x128xf32>, vector<128x128xf32>, vector<8x128xf32> -> vector<8x128xf32>
    %cst_10 = arith.constant -7.812500e-03 : f32
    %19 = vector.broadcast %cst_10 : f32 to vector<8x128xf32>
    %20 = arith.mulf %19, %18 : vector<8x128xf32>
    %21 = arith.addf %17, %20 : vector<8x128xf32>
    %c0_11 = arith.constant 0 : index
    %c0_12 = arith.constant 0 : index
    %22 = vector.load %arg7[%c0_11, %c0_12] : memref<8x128xf32, #tpu.memory_space<vmem>>, vector<8x128xf32>
    tpu.vector_store %arg7[%c0_11, %c0_12], %21 {strides = array<i32>} : memref<8x128xf32, #tpu.memory_space<vmem>>, vector<8x128xf32>,
    %c0_13 = arith.constant 0 : index
    %c0_14 = arith.constant 0 : index
    %23 = vector.load %arg8[%c0_13, %c0_14] : memref<8x128xf32, #tpu.memory_space<vmem>>, vector<8x128xf32>
    %cst_15 = arith.constant dense<0.000000e+00> : vector<8x128xf32>
    %24 = tpu.matmul %16, %6, %cst_15 {dimension_numbers = #tpu.dot_dimension_numbers<[1], [1], [0], [0], [0, 0, 1, 0], [], []>} : vector<8x128xf32>, vector<128x128xf32>, vector<8x128xf32> -> vector<8x128xf32>
    %25 = arith.addf %23, %24 : vector<8x128xf32>
    %c0_16 = arith.constant 0 : index
    %c0_17 = arith.constant 0 : index
    %26 = vector.load %arg8[%c0_16, %c0_17] : memref<8x128xf32, #tpu.memory_space<vmem>>, vector<8x128xf32>
    tpu.vector_store %arg8[%c0_16, %c0_17], %25 {strides = array<i32>} : memref<8x128xf32, #tpu.memory_space<vmem>>, vector<8x128xf32>,
    %c0_18 = arith.constant 0 : index
    %c0_19 = arith.constant 0 : index
    %27 = vector.load %arg9[%c0_18, %c0_19] : memref<8x1xf32, #tpu.memory_space<vmem>>, vector<8x1xf32>
    %cst_20 = arith.constant dense<0.000000e+00> : vector<8xf32>
    %28 = vector.multi_reduction <add>, %14, %cst_20 [1] : vector<8x128xf32> to vector<8xf32>
    %29 = vector.shape_cast %28 : vector<8xf32> to vector<8x1xf32>
    %30 = arith.addf %27, %29 : vector<8x1xf32>
    %c0_21 = arith.constant 0 : index
    %c0_22 = arith.constant 0 : index
    %31 = vector.load %arg9[%c0_21, %c0_22] : memref<8x1xf32, #tpu.memory_space<vmem>>, vector<8x1xf32>
    tpu.vector_store %arg9[%c0_21, %c0_22], %30 {strides = array<i32>} : memref<8x1xf32, #tpu.memory_space<vmem>>, vector<8x1xf32>,
    %c0_23 = arith.constant 0 : index
    %c0_24 = arith.constant 0 : index
    %32 = vector.load %arg10[%c0_23, %c0_24] : memref<8x1xf32, #tpu.memory_space<vmem>>, vector<8x1xf32>
    %cst_25 = arith.constant dense<0.000000e+00> : vector<8xf32>
    %33 = vector.multi_reduction <add>, %16, %cst_25 [1] : vector<8x128xf32> to vector<8xf32>
    %34 = vector.shape_cast %33 : vector<8xf32> to vector<8x1xf32>
    %35 = arith.addf %32, %34 : vector<8x1xf32>
    %c0_26 = arith.constant 0 : index
    %c0_27 = arith.constant 0 : index
    %36 = vector.load %arg10[%c0_26, %c0_27] : memref<8x1xf32, #tpu.memory_space<vmem>>, vector<8x1xf32>
    tpu.vector_store %arg10[%c0_26, %c0_27], %35 {strides = array<i32>} : memref<8x1xf32, #tpu.memory_space<vmem>>, vector<8x1xf32>,
    %c0_28 = arith.constant 0 : index
    %c0_29 = arith.constant 0 : index
    %37 = vector.load %arg11[%c0_28, %c0_29] : memref<128x1xf32, #tpu.memory_space<vmem>>, vector<128x1xf32>
    %cst_30 = arith.constant dense<0.000000e+00> : vector<128xf32>
    %38 = vector.multi_reduction <add>, %6, %cst_30 [1] : vector<128x128xf32> to vector<128xf32>
    %39 = vector.shape_cast %38 : vector<128xf32> to vector<128x1xf32>
    %40 = arith.addf %37, %39 : vector<128x1xf32>
    %c0_31 = arith.constant 0 : index
    %c0_32 = arith.constant 0 : index
    %41 = vector.load %arg11[%c0_31, %c0_32] : memref<128x1xf32, #tpu.memory_space<vmem>>, vector<128x1xf32>
    tpu.vector_store %arg11[%c0_31, %c0_32], %40 {strides = array<i32>} : memref<128x1xf32, #tpu.memory_space<vmem>>, vector<128x1xf32>,
    %c0_i32_33 = arith.constant 0 : i32
    %42 = arith.cmpi eq, %arg1, %c0_i32_33 : i32
    %43 = arith.extui %42 : i1 to i32
    %c0_i32_34 = arith.constant 0 : i32
    %44 = arith.cmpi ne, %43, %c0_i32_34 : i32
    scf.if %44 {
      %cst_35 = arith.constant 1.000000e+00 : f32
      %45 = vector.broadcast %cst_35 : f32 to vector<8x1xf32>
      %c0_36 = arith.constant 0 : index
      %c0_37 = arith.constant 0 : index
      %46 = vector.load %arg11[%c0_36, %c0_37] : memref<128x1xf32, #tpu.memory_space<vmem>>, vector<128x1xf32>
      %cst_38 = arith.constant dense<0.000000e+00> : vector<8x128xf32>
      %47 = tpu.matmul %45, %46, %cst_38 {dimension_numbers = #tpu.dot_dimension_numbers<[1], [1], [0], [0], [0, 0, 1, 0], [], []>} : vector<8x1xf32>, vector<128x1xf32>, vector<8x128xf32> -> vector<8x128xf32>
      %c0_39 = arith.constant 0 : index
      %c0_40 = arith.constant 0 : index
      %48 = vector.load %arg10[%c0_39, %c0_40] : memref<8x1xf32, #tpu.memory_space<vmem>>, vector<8x1xf32>
      %49 = vector.broadcast %48 : vector<8x1xf32> to vector<8x128xf32>
      %50 = arith.addf %49, %47 : vector<8x128xf32>
      %cst_41 = arith.constant 1.000000e+00 : f32
      %51 = vector.broadcast %cst_41 : f32 to vector<8x128xf32>
      %52 = arith.addf %50, %51 : vector<8x128xf32>
      %c0_42 = arith.constant 0 : index
      %c0_43 = arith.constant 0 : index
      %53 = vector.load %arg8[%c0_42, %c0_43] : memref<8x128xf32, #tpu.memory_space<vmem>>, vector<8x128xf32>
      %cst_44 = arith.constant 2.000000e+00 : f32
      %54 = vector.broadcast %cst_44 : f32 to vector<8x128xf32>
      %55 = arith.mulf %54, %53 : vector<8x128xf32>
      %cst_45 = arith.constant 1.000000e+00 : f32
      %56 = vector.broadcast %cst_45 : f32 to vector<8x128xf32>
      %57 = arith.addf %55, %56 : vector<8x128xf32>
      %58 = tpu.reciprocal %52 {approx = true} : vector<8x128xf32> -> vector<8x128xf32>
      %59 = arith.mulf %52, %58 : vector<8x128xf32>
      %cst_46 = arith.constant 2.000000e+00 : f32
      %60 = vector.broadcast %cst_46 : f32 to vector<8x128xf32>
      %61 = arith.subf %60, %59 : vector<8x128xf32>
      %62 = arith.mulf %58, %61 : vector<8x128xf32>
      %63 = arith.mulf %57, %62 : vector<8x128xf32>
      %cst_47 = arith.constant 1.000000e+00 : f32
      %64 = vector.broadcast %cst_47 : f32 to vector<8x128xf32>
      %65 = arith.subf %64, %63 : vector<8x128xf32>
      %c0_48 = arith.constant 0 : index
      %c0_49 = arith.constant 0 : index
      %66 = vector.load %arg7[%c0_48, %c0_49] : memref<8x128xf32, #tpu.memory_space<vmem>>, vector<8x128xf32>
      %c0_50 = arith.constant 0 : index
      %c0_51 = arith.constant 0 : index
      %67 = vector.load %arg9[%c0_50, %c0_51] : memref<8x1xf32, #tpu.memory_space<vmem>>, vector<8x1xf32>
      %cst_52 = arith.constant 7.812500e-03 : f32
      %68 = vector.broadcast %cst_52 : f32 to vector<8x1xf32>
      %69 = arith.mulf %68, %67 : vector<8x1xf32>
      %70 = vector.broadcast %69 : vector<8x1xf32> to vector<8x128xf32>
      %71 = arith.addf %66, %70 : vector<8x128xf32>
      %cst_53 = arith.constant 1.000000e+00 : f32
      %72 = vector.broadcast %cst_53 : f32 to vector<8x128xf32>
      %73 = arith.mulf %72, %65 : vector<8x128xf32>
      %74 = arith.addf %71, %73 : vector<8x128xf32>
      %c0_54 = arith.constant 0 : index
      %c0_55 = arith.constant 0 : index
      %c0_56 = arith.constant 0 : index
      %75 = vector.load %arg6[%c0_54, %c0_55, %c0_56] : memref<1x8x128xf32, #tpu.memory_space<vmem>>, vector<1x8x128xf32>
      %76 = vector.shape_cast %75 : vector<1x8x128xf32> to vector<8x128xf32>
      %77 = vector.shape_cast %74 : vector<8x128xf32> to vector<1x8x128xf32>
      tpu.vector_store %arg6[%c0_54, %c0_55, %c0_56], %77 {strides = array<i32>} : memref<1x8x128xf32, #tpu.memory_space<vmem>>, vector<1x8x128xf32>,
    } else {
    }
    return
  }
  func.func @transform_0(%arg0: i32, %arg1: i32) -> (i32, i32, i32) {
    %c0_i32 = arith.constant 0 : i32
    %c0_i32_0 = arith.constant 0 : i32
    %c0_i32_1 = arith.constant 0 : i32
    return %arg0, %c0_i32, %c0_i32_0 : i32, i32, i32
  }
  func.func @transform_1(%arg0: i32, %arg1: i32) -> (i32, i32, i32) {
    %c0_i32 = arith.constant 0 : i32
    %c0_i32_0 = arith.constant 0 : i32
    %c0_i32_1 = arith.constant 0 : i32
    return %arg0, %c0_i32, %c0_i32_0 : i32, i32, i32
  }
  func.func @transform_2(%arg0: i32, %arg1: i32) -> (i32, i32, i32) {
    %c0_i32 = arith.constant 0 : i32
    %c0_i32_0 = arith.constant 0 : i32
    return %arg0, %c0_i32, %arg1 : i32, i32, i32
  }
  func.func @transform_3(%arg0: i32, %arg1: i32) -> (i32, i32, i32) {
    %c0_i32 = arith.constant 0 : i32
    %c0_i32_0 = arith.constant 0 : i32
    return %arg0, %c0_i32, %arg1 : i32, i32, i32
  }
  func.func @transform_4(%arg0: i32, %arg1: i32) -> (i32, i32, i32) {
    %c0_i32 = arith.constant 0 : i32
    %c0_i32_0 = arith.constant 0 : i32
    %c0_i32_1 = arith.constant 0 : i32
    return %arg0, %c0_i32, %c0_i32_0 : i32, i32, i32
  }
}

</mosaic_0001>

<bundles_post_ra>
// kernel: tpu_custom_call.1
= control target key start
LH: loop header
LB: loop body
LE: loop exit
PB: predicated region body
PF: predicated region fallthrough
CT: control target
= control target key end

     0   :  { %s2154_s0 = inlined_call_operand.hbm [shape: f32[2,8,128], index: 0, kind: input, shape index: {}]   ;;  %s2155_s1 = inlined_call_operand.hbm [shape: f32[2,128,128], index: 1, kind: input, shape index: {}]   ;;  %s2156_s2 = inlined_call_operand.hbm [shape: f32[2,8,128], index: 2, kind: input, shape index: {}]   ;;  %s2157_s3 = inlined_call_operand.hbm [shape: f32[2,128,128], index: 3, kind: input, shape index: {}]   ;;  %s2158_s4 = inlined_call_operand.hbm [shape: f32[2,8,128], index: 4, kind: output, shape index: {}]  }
   0x1   :  { %2165 = sst [smem:[#allocation23_spill]] %s2155_s1 }
   0x2   :  { %9 = vsyncpa [#allocation8], 0 }
   0x3   :  { %11 = vsyncpa [#allocation8 + $0x1], 0 }
   0x4   :  { %12 = vsyncpa [#allocation11], 0 }
   0x5   :  { %14 = vsyncpa [#allocation11 + $0x1], 0 }
   0x6   :  { %15 = vsyncpa [#allocation14], 0 }
   0x7   :  { %17 = vsyncpa [#allocation14 + $0x1], 0 }
   0x8   :  { %18 = vsyncpa [#allocation9], 0 }
   0x9   :  { %20 = vsyncpa [#allocation9 + $0x1], 0  ;;  %s1658_s15 = smov 0   ;;  %s1660_s16 = smov 0  }
   0xa   :  { %s1662_s17 = smov 0   ;;  %s1664_s18 = smov 0  }
   0xb   :  { %s1666_s19 = smov 0   ;;  %s1668_s20 = smov 0  }
   0xc LB: > { %2166 = sst [smem:[#allocation20_spill]] %s1608_s17  ;;  %s1689_s21 = sadd.s32 4294967295, %s1620_s20   ;;  %s1620_s20 = sphi %s1668_s20, %s26_s20   ;;  %s1616_s19 = sphi %s1666_s19, %s2187_s19   ;;  %s1612_s18 = sphi %s1664_s18, %s2186_s18   ;;  %s1608_s17 = sphi %s1662_s17, %s2182_s17   ;;  %s1604_s16 = sphi %s1660_s16, %s2185_s16   ;;  %s1600_s15 = sphi %s1658_s15, %s2184_s15  }
   0xd   : > { %s1073_s22 = sadd.s32 4294967294, %s1620_s20   ;;  %s38_s23 = sadd.s32 1, %s1616_s19 }
   0xe   : > { %s45_s24 = sadd.s32 1, %s1608_s17  ;;  %p40_p0 = scmp.ge.s32.totalorder %s38_s23, 2 }
   0xf   : > { %p52_p1 = scmp.ne.s32.totalorder %s1608_s17, %s1604_s16  ;;  %p53_p2 = scmp.eq.s32.totalorder %s1620_s20, 0 }
  0x10   : > { %p58_p3 = scmp.ne.s32.totalorder %s1604_s16, %s1600_s15  ;;  %s2189_s23 = smov (%p40_p0, %s38_s23), 0 }
  0x11   : > { %2167 = sst [smem:[#allocation21_spill]] %s2189_s23  ;;  %p1701_p4 = por %p53_p2, %p52_p1 }
  0x12   : > { %p59_p5 = scmp.eq.s32.totalorder %s1689_s21, 0  ;;  %s42_s26 = ssub.s32 %s1616_s19, %s2189_s23 }
  0x13   : > { %p164_p6 = scmp.eq.s32.totalorder %s1689_s21, 1  ;;  %p43_p7 = scmp.eq.s32.totalorder %s42_s26, 0 }
  0x14   : > { %p1709_p8 = por %p59_p5, %p58_p3  ;;  %p170_p10 = scmp.eq.s32.totalorder %s1073_s22, 1 }
  0x15   : > { %p1713_p9 = por %p164_p6, %p52_p1  ;;  %p1350_p13 = scmp.lt.s32.totalorder %s1620_s20, 2 }
  0x16   : > { %s1718_s29 = scalar_select %p43_p7, %s1608_s17, %s45_s24  }
  0x17   : > { %p1720_p11 = por %p170_p10, %p58_p3  ;;  %s1727_s5 = sand.u32 1, %s1608_s17  }
  0x18   : > { %2171 = sst [smem:[#allocation22_spill]] %s1718_s29  ;;  %s208_s6 = sand.u32 1, %s1620_s20  }
  0x19   : > { %s2160_s7 = sshll.u32 %s1727_s5, 7  ;;  %p1733_p0 = pnand %p1350_p13, %p1701_p4 }
  0x1a   : > { %s2161_s9 = sshll.u32 %s1616_s19, 11  ;;  %s2174_s1 = sld [smem:[#allocation23_spill]] }
  0x1b   : > { %s212_s13 = scalar_lea.vmem [#allocation10], %s2160_s7  ;;  %s1745_s22 = scalar_lea.sflag [#allocation11], %s208_s6 }
  0x1c   : > { %s219_s14 = sshll.u32 %s212_s13, 4  ;;  %p1422_p1 = pneg %p1733_p0  ;;  %s220_s14 = int_to_ptr.vmem [resolvable:$true] %s219_s14 }
  0x1d   : > { %s1433_s24 = scalar_lea.vmem %s220_s14, 2048  ;;  %s1622_s25 = smov [#allocation10]  }
  0x1e   : > { %p1434_p2 = scmp.ne.s32.totalorder %s220_s14, %s1433_s24  ;;  %s1438_s26 = sshll.u32 %s1622_s25, 4  ;;  %s1439_s26 = int_to_ptr.vmem [resolvable:$false] %s1438_s26 }
  0x1f   : > { %s1440_s23 = scalar_lea.vmem %s1439_s26, 4096  ;;  %p1441_p5 = scmp.lt.s32.totalorder %s220_s14, %s1439_s26 }
  0x20   : > { %s218_s12 = scalar_lea.hbm %s2174_s1, %s2161_s9  ;;  %p1436_p3 = pnand %p1434_p2, %p1422_p1 }
  0x21   : > { %p1442_p6 = scmp.lt.s32.totalorder %s1440_s23, %s1433_s24 }
  0x22   : > { %p1437_p4 = pneg %p1436_p3 }
  0x23   : > { %p1443_p7 = por %p1442_p6, %p1441_p5 }
  0x25   : > { %p1444_p10 = pnand %p1443_p7, %p1437_p4 }
  0x27   : > { %1447 = shalt.err (!%p1444_p10)
}
  0x28   : > { %s2163_s10 = smov 128   ;;  %s2164_s6 = smov 8  }
  0x29   : > { %1339 = dma.hbm_to_vmem [thread:$0]  (!%p1733_p0), %s218_s12, 2048, %s220_s14, %s1745_s22, %s2163_s10, %s2163_s10, %s2164_s6  }
  0x2a   : > { %p1086_p13 = scmp.ge.s32.totalorder %s1620_s20, 1  ;;  %p268_p2 = scmp.lt.s32.totalorder %s1620_s20, 3 }
  0x2b   : > { %s1076_s11 = sshll.u32 %s1727_s5, 3  ;;  %s1077_s13 = sshll.u32 %s1616_s19, 7 }
  0x2c   : > { %p1760_p3 = pnand %p1086_p13, %p268_p2  ;;  %s199_s26 = scalar_lea.hbm %s2154_s0, %s1077_s13 }
  0x2d   : > { %s194_s7 = scalar_lea.vmem [#allocation7], %s1076_s11  ;;  %s1772_s17 = scalar_lea.hbm %s2156_s2, %s1077_s13 }
  0x2e   : > { %s201_s9 = sshll.u32 %s194_s7, 4  ;;  %s191_s12 = scalar_lea.sflag [#allocation8], %s1727_s5  ;;  %s202_s9 = int_to_ptr.vmem [resolvable:$true] %s201_s9 }
  0x2f   : > { %s1461_s14 = scalar_lea.vmem %s202_s9, 128  ;;  %s1625_s10 = smov [#allocation7]  }
  0x30   : > { %p1462_p4 = scmp.ne.s32.totalorder %s202_s9, %s1461_s14  ;;  %s1466_s6 = sshll.u32 %s1625_s10, 4  ;;  %s1467_s6 = int_to_ptr.vmem [resolvable:$false] %s1466_s6 }
  0x31   : > { %s1468_s24 = scalar_lea.vmem %s1467_s6, 256  ;;  %p1469_p7 = scmp.lt.s32.totalorder %s202_s9, %s1467_s6 }
  0x32   : > { %p1464_p5 = pnand %p1462_p4, %p1422_p1  ;;  %p1470_p10 = scmp.lt.s32.totalorder %s1468_s24, %s1461_s14 }
  0x34   : > { %p1465_p6 = pneg %p1464_p5  ;;  %p1471_p13 = por %p1470_p10, %p1469_p7 }
  0x36   : > { %p1472_p2 = pnand %p1471_p13, %p1465_p6 }
  0x38   : > { %1475 = shalt.err (!%p1472_p2)
}
  0x39   : > { %1336 = dma.hbm_to_vmem [thread:$0]  (!%p1733_p0), %s199_s26, 128, %s202_s9, %s191_s12  }
  0x3a   : > { %s233_s1 = scalar_lea.vmem [#allocation12], %s1076_s11  ;;  %s1626_s10 = smov [#allocation12]  }
  0x3b   : > { %s241_s29 = sshll.u32 %s233_s1, 4  ;;  %s1494_s13 = sshll.u32 %s1626_s10, 4  ;;  %s242_s29 = int_to_ptr.vmem [resolvable:$true] %s241_s29  ;;  %s1495_s13 = int_to_ptr.vmem [resolvable:$false] %s1494_s13 }
  0x3c   : > { %s1489_s7 = scalar_lea.vmem %s242_s29, 128  ;;  %s1496_s6 = scalar_lea.vmem %s1495_s13, 256 }
  0x3d   : > { %p1490_p12 = scmp.ne.s32.totalorder %s242_s29, %s1489_s7  ;;  %p1497_p7 = scmp.lt.s32.totalorder %s242_s29, %s1495_s13 }
  0x3e   : > { %p1498_p6 = scmp.lt.s32.totalorder %s1496_s6, %s1489_s7 }
  0x3f   : > { %p1492_p4 = pnand %p1490_p12, %p1422_p1 }
  0x40   : > { %p1499_p10 = por %p1498_p6, %p1497_p7 }
  0x41   : > { %p1493_p5 = pneg %p1492_p4 }
  0x43   : > { %p1500_p13 = pnand %p1499_p10, %p1493_p5 }
  0x45   : > { %1503 = shalt.err (!%p1500_p13)
}
  0x46   : > { %1342 = dma.hbm_to_vmem [thread:$0]  (!%p1733_p0), %s1772_s17, 128, %s242_s29, %s1745_s22  }
  0x47   : > { %s2176_s9 = sshll.u32 %s1616_s19, 11  ;;  %s2177_s12 = sshll.u32 %s1727_s5, 7 }
  0x48   : > { %s259_s26 = scalar_lea.hbm %s2157_s3, %s2176_s9  ;;  %s252_s14 = scalar_lea.vmem [#allocation13], %s2177_s12 }
  0x49   : > { %s260_s24 = sshll.u32 %s252_s14, 4  ;;  %s249_s1 = scalar_lea.sflag [#allocation14], %s1727_s5  ;;  %s261_s24 = int_to_ptr.vmem [resolvable:$true] %s260_s24 }
  0x4a   : > { %s1517_s7 = scalar_lea.vmem %s261_s24, 2048  ;;  %s1627_s10 = smov [#allocation13]  }
  0x4b   : > { %p1518_p12 = scmp.ne.s32.totalorder %s261_s24, %s1517_s7  ;;  %s1522_s13 = sshll.u32 %s1627_s10, 4  ;;  %s1523_s13 = int_to_ptr.vmem [resolvable:$false] %s1522_s13 }
  0x4c   : > { %s1524_s17 = scalar_lea.vmem %s1523_s13, 4096  ;;  %p1525_p5 = scmp.lt.s32.totalorder %s261_s24, %s1523_s13 }
  0x4d   : > { %p1520_p2 = pnand %p1518_p12, %p1422_p1  ;;  %p1526_p7 = scmp.lt.s32.totalorder %s1524_s17, %s1517_s7 }
  0x4f   : > { %p1521_p4 = pneg %p1520_p2  ;;  %p1527_p6 = por %p1526_p7, %p1525_p5 }
  0x51   : > { %p1528_p10 = pnand %p1527_p6, %p1521_p4 }
  0x53   : > { %1531 = shalt.err (!%p1528_p10)
}
  0x54   : > { %s2178_s22 = smov 8   ;;  %s2179_s29 = smov 128  }
  0x55   : > { %1345 = dma.hbm_to_vmem [thread:$0]  (!%p1733_p0), %s259_s26, 2048, %s261_s24, %s249_s1, %s2179_s29, %s2179_s29, %s2178_s22  }
  0x56   : > { %272 = sbr.rel (%p1760_p3) target bundleno = 695 (0x2b7), region = 36  ;;  %s1806_s5 = sand.u32 (!%p1760_p3), 1, %s1604_s16  }
  0x57   : > { %s1809_s6 = sshll.u32 (!%p1760_p3), %s1806_s5, 3  ;;  %s275_s9 = scalar_lea.sflag (!%p1760_p3), [#allocation8], %s1806_s5 }
  0x58   : > { %s278_s11 = scalar_lea.vmem (!%p1760_p3), [#allocation7], %s1809_s6 }
  0x5b   : > { %1583 = dma.done.wait (%p1709_p8), %s275_s9, 128  }
  0x5c   : > { %1585 = vsyncadd (%p1709_p8), %s275_s9, 4294967168  ;;  %s283_s8 = sand.u32 1, %s1689_s21   ;;  %s1088_s23 = sshll.u32 %s1806_s5, 7 }
  0x5d   : > { %s284_s25 = scalar_lea.sflag [#allocation11], %s283_s8  ;;  %s1819_s26 = scalar_lea.vmem [#allocation10], %s1088_s23 }
  0x5e   : > { %1587 = dma.done.wait (%p1709_p8), %s284_s25, 2176  }
  0x5f   : > { %1589 = vsyncadd (%p1709_p8), %s284_s25, 4294965120  ;;  %s296_s12 = scalar_lea.vmem [#allocation12], %s1809_s6  ;;  %s302_s14 = scalar_lea.sflag [#allocation14], %s1806_s5 }
  0x60   : > { %s1827_s24 = scalar_lea.vmem [#allocation13], %s1088_s23 }
  0x61   : > { %1591 = dma.done.wait (%p1709_p8), %s302_s14, 2048  }
  0x62   : > { %1593 = vsyncadd (%p1709_p8), %s302_s14, 4294965248  ;;  %v1833_v0 = vld [vmem:[%s278_s11] sm:$0xff]  ;;  %v1837_v1 = vld [vmem:[%s1827_s24 + $0x78] sm:$0xff]  ;;  %v1628_v11 = vmov 0.0   ;;  %vm451_vm0 = vcmask 7168   ;;  %vm1629_vm1 = vmmov 0  }
  0x63   : > { %350 = vmax.xlane.f32.xlu0 %v1833_v0  ;;  %v1840_v2 = vld [vmem:[%s1827_s24 + $0x70] sm:$0xff]  ;;  %v1845_v3 = vld [vmem:[%s1827_s24 + $0x68] sm:$0xff]  ;;  %v1849_v4 = vld [vmem:[%s1827_s24 + $0x58] sm:$0xff]  ;;  %1218 = vmatprep.subr.mxu1 %v1628_v11  ;;  %469 = vst.msk [vmem:[#allocation6 + $0x78] sm:$0xff] %vm451_vm0, %v1628_v11  ;;  %s1110_s21 = sshll.u32 %s1612_s18, 7  ;;  %s344_s27 = scalar_lea.vmem [#allocation15], %s1809_s6 }
  0x64   : > { %707 = vadd.xlane.f32.xlu1 %v1840_v2  ;;  %v1853_v5 = vld [vmem:[%s1827_s24 + $0x48] sm:$0xff]  ;;  %v1857_v6 = vld [vmem:[%s1827_s24 + $0x38] sm:$0xff]  ;;  %1183 = vmatprep.subr.mxu0 %v1628_v11  ;;  %452 = vst.msk [vmem:[#allocation4] sm:$0xff] %vm451_vm0, %v1628_v11  ;;  %453 = vst.msk [vmem:[#allocation5] sm:$0xff] %vm451_vm0, %v1628_v11  ;;  %s925_s1 = sshll.u32 %s344_s27, 4  ;;  %s923_s13 = scalar_lea.hbm %s2158_s4, %s1110_s21  ;;  %s926_s1 = int_to_ptr.vmem [resolvable:$true] %s925_s1 }
  0x65   : > { %v1861_v7 = vld [vmem:[%s1827_s24 + $0x28] sm:$0xff]  ;;  %v1865_v8 = vld [vmem:[%s1827_s24 + $0x18] sm:$0xff]  ;;  %1219 = vmatpush3.xpose.msra.mxu1 %v1837_v1  ;;  %454 = vst.msk [vmem:[#allocation6] sm:$0xff] %vm451_vm0, %v1628_v11  ;;  %455 = vst.msk [vmem:[#allocation6 + $0x8] sm:$0xff] %vm451_vm0, %v1628_v11  ;;  %1250 = vmatprep.mubr.msk.f32.mxu1 %vm1629_vm1, %v1628_v11  ;;  %s912_s17 = scalar_lea.sflag [#allocation9], %s1806_s5  ;;  %s1532_s22 = scalar_lea.vmem %s926_s1, 128 }
  0x66   : > { %v1869_v9 = vld [vmem:[%s1827_s24 + $0x8] sm:$0xff]  ;;  %v1872_v10 = vld [vmem:[%s296_s12] sm:$0xff]  ;;  %1220 = vmatprep.subr.mxu1 %v1628_v11  ;;  %456 = vst.msk [vmem:[#allocation6 + $0x10] sm:$0xff] %vm451_vm0, %v1628_v11  ;;  %457 = vst.msk [vmem:[#allocation6 + $0x18] sm:$0xff] %vm451_vm0, %v1628_v11  ;;  %1215 = vmatprep.mubr.msk.f32.mxu0 %vm1629_vm1, %v1628_v11  ;;  %p1533_p8 = scmp.ne.s32.totalorder %s926_s1, %s1532_s22  ;;  %s1632_s29 = smov [#allocation15]  }
  0x67   : > { %709 = vadd.xlane.f32.xlu0 %v1837_v1  ;;  %v487_v12 = vand.u32 2147483647, %v1872_v10  ;;  %v377_v14 = vld [vmem:[%s1819_s26 + $0x78] sm:$0xff]  ;;  %458 = vst.msk [vmem:[#allocation6 + $0x20] sm:$0xff] %vm451_vm0, %v1628_v11  ;;  %459 = vst.msk [vmem:[#allocation6 + $0x28] sm:$0xff] %vm451_vm0, %v1628_v11  ;;  %v376_v16 = vld [vmem:[%s1819_s26 + $0x70] sm:$0xff] }
  0x68   : > { %1184 = vmatpush3.xpose.msra.mxu0 %v377_v14  ;;  %460 = vst.msk [vmem:[#allocation6 + $0x30] sm:$0xff] %vm451_vm0, %v1628_v11  ;;  %461 = vst.msk [vmem:[#allocation6 + $0x38] sm:$0xff] %vm451_vm0, %v1628_v11  ;;  %v375_v17 = vld [vmem:[%s1819_s26 + $0x68] sm:$0xff]  ;;  %v1929_v18 = vld [vmem:[%s1827_s24 + $0x60] sm:$0xff]  ;;  %v500_v34 = vmax.f32 %v1872_v10, 0.0  ;;  %p1534_p0 = pnand %p1533_p8, %p1713_p9  ;;  %s1536_s9 = sshll.u32 %s1632_s29, 4  ;;  %s1537_s9 = int_to_ptr.vmem [resolvable:$false] %s1536_s9 }
  0x69   : > { %v488_v13 = vsub.f32 0.0, %v487_v12  ;;  %462 = vst.msk [vmem:[#allocation6 + $0x40] sm:$0xff] %vm451_vm0, %v1628_v11  ;;  %463 = vst.msk [vmem:[#allocation6 + $0x48] sm:$0xff] %vm451_vm0, %v1628_v11  ;;  %1221 = vmatpush3.xpose.msra.mxu1 %v1840_v2  ;;  %1185 = vmatprep.subr.mxu0 %v1628_v11  ;;  %v374_v19 = vld [vmem:[%s1819_s26 + $0x60] sm:$0xff]  ;;  %v373_v20 = vld [vmem:[%s1819_s26 + $0x58] sm:$0xff]  ;;  %s1538_s18 = scalar_lea.vmem %s1537_s9, 256  ;;  %p1539_p3 = scmp.lt.s32.totalorder %s926_s1, %s1537_s9 }
  0x6a   : > { %464 = vst.msk [vmem:[#allocation6 + $0x50] sm:$0xff] %vm451_vm0, %v1628_v11  ;;  %465 = vst.msk [vmem:[#allocation6 + $0x58] sm:$0xff] %vm451_vm0, %v1628_v11  ;;  %1222 = vmatprep.subr.mxu1 %v1628_v11  ;;  %v1940_v22 = vld [vmem:[%s1827_s24 + $0x50] sm:$0xff]  ;;  %v372_v24 = vld [vmem:[%s1819_s26 + $0x50] sm:$0xff]  ;;  %p1535_p1 = pneg %p1534_p0  ;;  %p1540_p13 = scmp.lt.s32.totalorder %s1538_s18, %s1532_s22 }
  0x6b   : > { %705 = vadd.xlane.f32.xlu0 %v1845_v3  ;;  %v489_v15 = vmul.f32 1.442695, %v488_v13  ;;  %466 = vst.msk [vmem:[#allocation6 + $0x60] sm:$0xff] %vm451_vm0, %v1628_v11  ;;  %467 = vst.msk [vmem:[#allocation6 + $0x68] sm:$0xff] %vm451_vm0, %v1628_v11  ;;  %v371_v25 = vld [vmem:[%s1819_s26 + $0x48] sm:$0xff]  ;;  %v1951_v27 = vld [vmem:[%s1827_s24 + $0x40] sm:$0xff] }
  0x6c   : > { %468 = vst.msk [vmem:[#allocation6 + $0x70] sm:$0xff] %vm451_vm0, %v1628_v11  ;;  %1186 = vmatpush3.xpose.msra.mxu0 %v376_v16  ;;  %v370_v28 = vld [vmem:[%s1819_s26 + $0x40] sm:$0xff]  ;;  %v369_v31 = vld [vmem:[%s1819_s26 + $0x38] sm:$0xff]  ;;  %v368_v37 = vld [vmem:[%s1819_s26 + $0x30] sm:$0xff]  ;;  %p1541_p12 = por %p1540_p13, %p1539_p3 }
  0x6d   : > { %1408 = vpow2.f32 %v489_v15  ;;  %1223 = vmatpush3.xpose.msra.mxu1 %v1845_v3  ;;  %1187 = vmatprep.subr.mxu0 %v1628_v11  ;;  %v1963_v35 = vld [vmem:[%s1827_s24 + $0x30] sm:$0xff]  ;;  %v367_v41 = vld [vmem:[%s1819_s26 + $0x28] sm:$0xff]  ;;  %v1978_v43 = vld [vmem:[%s1827_s24 + $0x20] sm:$0xff] }
  0x6e   : > { %1224 = vmatprep.subr.mxu1 %v1628_v11  ;;  %v1986_v44 = vld [vmem:[%s1827_s24 + $0x10] sm:$0xff]  ;;  %v1996_v46 = vld [vmem:[%s1827_s24] sm:$0xff]  ;;  %v678_v50 = vld [vmem:[#allocation6 + $0x78] sm:$0xff]  ;;  %p1542_p2 = pnand %p1541_p12, %p1535_p1 }
  0x6f   : > { %701 = vadd.xlane.f32.xlu0 %v1849_v4  ;;  %v366_v60 = vld [vmem:[%s1819_s26 + $0x20] sm:$0xff]  ;;  %v365_v62 = vld [vmem:[%s1819_s26 + $0x18] sm:$0xff]  ;;  %v364_v13 = vld [vmem:[%s1819_s26 + $0x10] sm:$0xff] }
  0x70   : > { %1188 = vmatpush3.xpose.msra.mxu0 %v375_v17  ;;  %v363_v15 = vld [vmem:[%s1819_s26 + $0x8] sm:$0xff]  ;;  %v672_v16 = vld [vmem:[#allocation6 + $0x48] sm:$0xff] }
  0x71   : > { %1225 = vmatpush3.xpose.msra.mxu1 %v1929_v18  ;;  %1189 = vmatprep.subr.mxu0 %v1628_v11 }
  0x72   : > { %1226 = vmatprep.subr.mxu1 %v1628_v11  ;;  %v676_v57 = vld [vmem:[#allocation6 + $0x68] sm:$0xff] }
  0x73   : > { %697 = vadd.xlane.f32.xlu0 %v1853_v5  ;;  %v677_v51 = vld [vmem:[#allocation6 + $0x70] sm:$0xff] }
  0x74   : > { %1190 = vmatpush3.xpose.msra.mxu0 %v374_v19 }
  0x75   : > { %1227 = vmatpush3.xpose.msra.mxu1 %v1849_v4  ;;  %1191 = vmatprep.subr.mxu0 %v1628_v11 }
  0x76   : > { %1228 = vmatprep.subr.mxu1 %v1628_v11 }
  0x77   : > { %693 = vadd.xlane.f32.xlu0 %v1857_v6 }
  0x78   : > { %1192 = vmatpush3.xpose.msra.mxu0 %v373_v20  ;;  %v362_v20 = vld [vmem:[%s1819_s26] sm:$0xff] }
  0x79   : > { %1229 = vmatpush3.xpose.msra.mxu1 %v1940_v22  ;;  %1193 = vmatprep.subr.mxu0 %v1628_v11 }
  0x7a   : > { %v1409_v21 = vpop.eup %1408  ;;  %1230 = vmatprep.subr.mxu1 %v1628_v11 }
  0x7b   : > { %689 = vadd.xlane.f32.xlu0 %v1861_v7  ;;  %v491_v23 = vadd.f32 1.0, %v1409_v21  ;;  %v494_v26 = vmul.f32 -0.5, %v1409_v21  ;;  %v497_v30 = vand.u32 2147483647, %v1409_v21 }
  0x7c   : > { %1194 = vmatpush3.xpose.msra.mxu0 %v372_v24 }
  0x7d   : > { %1410 = vlog2.f32 %v491_v23  ;;  %1231 = vmatpush3.xpose.msra.mxu1 %v1853_v5  ;;  %1195 = vmatprep.subr.mxu0 %v1628_v11  ;;  %v495_v29 = vadd.f32 1.0, %v494_v26  ;;  %vm498_vm2 = vcmp.lt.f32.partialorder %v497_v30, 0.0004427343 }
  0x7e   : > { %1232 = vmatprep.subr.mxu1 %v1628_v11 }
  0x7f   : > { %685 = vadd.xlane.f32.xlu0 %v1865_v8  ;;  %v496_v32 = vmul.f32 %v1409_v21, %v495_v29  ;;  %v670_v21 = vld [vmem:[#allocation6 + $0x38] sm:$0xff] }
  0x80   : > { %1196 = vmatpush3.xpose.msra.mxu0 %v371_v25  ;;  %v668_v25 = vld [vmem:[#allocation6 + $0x28] sm:$0xff]  ;;  %v666_v29 = vld [vmem:[#allocation6 + $0x18] sm:$0xff] }
  0x81   : > { %1233 = vmatpush3.xpose.msra.mxu1 %v1951_v27  ;;  %1197 = vmatprep.subr.mxu0 %v1628_v11 }
  0x82   : > { %1234 = vmatprep.subr.mxu1 %v1628_v11 }
  0x83   : > { %681 = vadd.xlane.f32.xlu0 %v1869_v9 }
  0x84   : > { %1198 = vmatpush3.xpose.msra.mxu0 %v370_v28 }
  0x85   : > { %1235 = vmatpush3.xpose.msra.mxu1 %v1857_v6  ;;  %1199 = vmatprep.subr.mxu0 %v1628_v11 }
  0x86   : > { %1236 = vmatprep.subr.mxu1 %v1628_v11 }
  0x88   : > { %1200 = vmatpush3.xpose.msra.mxu0 %v369_v31 }
  0x89   : > { %1237 = vmatpush3.xpose.msra.mxu1 %v1963_v35  ;;  %1201 = vmatprep.subr.mxu0 %v1628_v11 }
  0x8a   : > { %v1411_v33 = vpop.eup %1410  ;;  %1238 = vmatprep.subr.mxu1 %v1628_v11 }
  0x8b   : > { %v493_v36 = vmul.f32 0.6931472, %v1411_v33 }
  0x8c   : > { %1202 = vmatpush3.xpose.msra.mxu0 %v368_v37  ;;  %v1630_v37 = vmov 0  }
  0x8d   : > { %v499_v38 = vsel %vm498_vm2, %v496_v32, %v493_v36  ;;  %1239 = vmatpush3.xpose.msra.mxu1 %v1861_v7  ;;  %1203 = vmatprep.subr.mxu0 %v1628_v11  ;;  %v664_v32 = vld [vmem:[#allocation6 + $0x8] sm:$0xff]  ;;  %v658_v36 = vld [vmem:[#allocation5] sm:$0xff] }
  0x8e   : > { %v1969_v39 = vadd.f32 %v500_v34, %v499_v38  ;;  %1240 = vmatprep.subr.mxu1 %v1628_v11  ;;  %1407 = vset.pattern.permute.xlu1 %v1630_v37 }
  0x8f   : > { %1406 = vset.pattern.permute.xlu0 %v1630_v37 }
  0x90   : > { %v502_v40 = vsub.f32 %v1872_v10, %v1969_v39  ;;  %1204 = vmatpush3.xpose.msra.mxu0 %v367_v41 }
  0x91   : > { %1241 = vmatpush3.xpose.msra.mxu1 %v1978_v43  ;;  %1205 = vmatprep.subr.mxu0 %v1628_v11 }
  0x92   : > { %v503_v42 = vmul.f32 1.442695, %v502_v40  ;;  %1242 = vmatprep.subr.mxu1 %v1628_v11 }
  0x94   : > { %1412 = vpow2.f32 %v503_v42  ;;  %1206 = vmatpush3.xpose.msra.mxu0 %v366_v60  ;;  %v675_v42 = vld [vmem:[#allocation6 + $0x60] sm:$0xff] }
  0x95   : > { %1243 = vmatpush3.xpose.msra.mxu1 %v1865_v8  ;;  %1207 = vmatprep.subr.mxu0 %v1628_v11 }
  0x96   : > { %1244 = vmatprep.subr.mxu1 %v1628_v11 }
  0x98   : > { %1208 = vmatpush3.xpose.msra.mxu0 %v365_v62 }
  0x99   : > { %1245 = vmatpush3.xpose.msra.mxu1 %v1986_v44  ;;  %1209 = vmatprep.subr.mxu0 %v1628_v11 }
  0x9a   : > { %1246 = vmatprep.subr.mxu1 %v1628_v11 }
  0x9c   : > { %1210 = vmatpush3.xpose.msra.mxu0 %v364_v13 }
  0x9d   : > { %1247 = vmatpush3.xpose.msra.mxu1 %v1869_v9  ;;  %1211 = vmatprep.subr.mxu0 %v1628_v11 }
  0x9e   : > { %1248 = vmatprep.subr.mxu1 %v1628_v11 }
  0xa0   : > { %1212 = vmatpush3.xpose.msra.mxu0 %v363_v15 }
  0xa1   : > { %v1991_v45 = vpop.eup %1412  ;;  %1249 = vmatpush3.xpose.msra.mxu1 %v1996_v46  ;;  %1213 = vmatprep.subr.mxu0 %v1628_v11 }
  0xa2   : > { %659 = vadd.xlane.f32.xlu0 %v1991_v45  ;;  %1288 = vmatprep.subr.mxu1 %v1628_v11 }
  0xa4   : > { %1251 = vmatmul.mubr.f32.vlgmr.msra.gmra.mxu1 %v1872_v10  ;;  %1214 = vmatpush3.xpose.msra.mxu0 %v362_v20 }
  0xa5   : > { %1320 = vmatprep.mubr.msk.f32.mxu1 %vm1629_vm1, %v1628_v11  ;;  %1253 = vmatprep.subr.mxu0 %v1628_v11 }
  0xec   : > { %v351_v47 = vpop.xlane.xlu0 %350 }
  0xed   : > { %v352_v48 = vsub.f32 %v1833_v0, %v351_v47  ;;  %v708_v53 = vpop.xlane.xlu1 %707  ;;  %v674_v0 = vld [vmem:[#allocation6 + $0x58] sm:$0xff] }
  0xee   : > { %v725_v55 = vadd.f32 %v708_v53, %v677_v51 }
  0xef   : > { %v353_v49 = vmul.f32 1.442695, %v352_v48 }
  0xf0   : > { %v710_v52 = vpop.xlane.xlu0 %709  ;;  %741 = vst.msk [vmem:[#allocation6 + $0x70] sm:$0xff] %vm451_vm0, %v725_v55 }
  0xf1   : > { %1414 = vpow2.f32 %v353_v49  ;;  %v726_v54 = vadd.f32 %v710_v52, %v678_v50  ;;  %v673_v49 = vld [vmem:[#allocation6 + $0x50] sm:$0xff]  ;;  %v671_v52 = vld [vmem:[#allocation6 + $0x40] sm:$0xff] }
  0xf3   : > { %742 = vst.msk [vmem:[#allocation6 + $0x78] sm:$0xff] %vm451_vm0, %v726_v54 }
  0xf4   : > { %v706_v58 = vpop.xlane.xlu0 %705 }
  0xf5   : > { %v724_v59 = vadd.f32 %v706_v58, %v676_v57  ;;  %v669_v58 = vld [vmem:[#allocation6 + $0x30] sm:$0xff] }
  0xf7   : > { %740 = vst.msk [vmem:[#allocation6 + $0x68] sm:$0xff] %vm451_vm0, %v724_v59  ;;  %v760_v63 = vld [vmem:[#allocation6 + $0x70] sm:$0xff] }
  0xf8   : > { %v702_v10 = vpop.xlane.xlu0 %701 }
  0xf9   : > { %v722_v12 = vadd.f32 %v702_v10, %v674_v0  ;;  %v667_v0 = vld [vmem:[#allocation6 + $0x20] sm:$0xff] }
  0xfa   : > { %v761_v61 = vld [vmem:[#allocation6 + $0x78] sm:$0xff] }
  0xfb   : > { %1289 = vmatpush3.xpose.msk.msra.mxu1 %vm451_vm0, %v761_v61  ;;  %738 = vst.msk [vmem:[#allocation6 + $0x58] sm:$0xff] %vm451_vm0, %v722_v12 }
  0xfc   : > { %1290 = vmatprep.subr.mxu1 %v1628_v11  ;;  %v698_v17 = vpop.xlane.xlu0 %697 }
  0xfd   : > { %v720_v19 = vadd.f32 %v698_v17, %v672_v16  ;;  %v665_v17 = vld [vmem:[#allocation6 + $0x10] sm:$0xff] }
  0xfe   : > { %v2004_v56 = vpop.eup %1414  ;;  %v759_v14 = vld [vmem:[#allocation6 + $0x68] sm:$0xff] }
  0xff   : > { %355 = vadd.xlane.f32.xlu1 %v2004_v56  ;;  %1291 = vmatpush3.xpose.msk.msra.mxu1 %vm451_vm0, %v760_v63  ;;  %736 = vst.msk [vmem:[#allocation6 + $0x48] sm:$0xff] %vm451_vm0, %v720_v19 }
 0x100   : > { %1292 = vmatprep.subr.mxu1 %v1628_v11  ;;  %v694_v23 = vpop.xlane.xlu0 %693 }
 0x101   : > { %v718_v24 = vadd.f32 %v694_v23, %v670_v21 }
 0x102   : > { %v757_v60 = vld [vmem:[#allocation6 + $0x58] sm:$0xff] }
 0x103   : > { %703 = vadd.xlane.f32.xlu1 %v1929_v18  ;;  %1293 = vmatpush3.xpose.msk.msra.mxu1 %vm451_vm0, %v759_v14  ;;  %734 = vst.msk [vmem:[#allocation6 + $0x38] sm:$0xff] %vm451_vm0, %v718_v24 }
 0x104   : > { %1294 = vmatprep.subr.mxu1 %v1628_v11  ;;  %v690_v26 = vpop.xlane.xlu0 %689 }
 0x105   : > { %v716_v28 = vadd.f32 %v690_v26, %v668_v25  ;;  %v652_v26 = vld [vmem:[#allocation4] sm:$0xff] }
 0x106   : > { %v755_v20 = vld [vmem:[#allocation6 + $0x48] sm:$0xff] }
 0x107   : > { %699 = vadd.xlane.f32.xlu1 %v1940_v22  ;;  %732 = vst.msk [vmem:[#allocation6 + $0x28] sm:$0xff] %vm451_vm0, %v716_v28 }
 0x108   : > { %v686_v30 = vpop.xlane.xlu0 %685 }
 0x109   : > { %v714_v31 = vadd.f32 %v686_v30, %v666_v29 }
 0x10a   : > { %v753_v28 = vld [vmem:[#allocation6 + $0x38] sm:$0xff] }
 0x10b   : > { %695 = vadd.xlane.f32.xlu1 %v1951_v27  ;;  %730 = vst.msk [vmem:[#allocation6 + $0x18] sm:$0xff] %vm451_vm0, %v714_v31 }
 0x10c   : > { %v682_v33 = vpop.xlane.xlu0 %681 }
 0x10d   : > { %v712_v34 = vadd.f32 %v682_v33, %v664_v32 }
 0x10f   : > { %691 = vadd.xlane.f32.xlu1 %v1963_v35  ;;  %728 = vst.msk [vmem:[#allocation6 + $0x8] sm:$0xff] %vm451_vm0, %v712_v34 }
 0x113   : > { %687 = vadd.xlane.f32.xlu1 %v1978_v43 }
 0x117   : > { %683 = vadd.xlane.f32.xlu1 %v1986_v44 }
 0x11b   : > { %679 = vadd.xlane.f32.xlu1 %v1996_v46 }
 0x11f   : > { %653 = vadd.xlane.f32.xlu1 %v1969_v39 }
 0x12b   : > { %v660_v38 = vpop.xlane.xlu0 %659 }
 0x12c   : > { %v661_v39 = vadd.f32 %v660_v38, %v658_v36 }
 0x12e   : > { %662 = vst.msk [vmem:[#allocation5] sm:$0xff] %vm451_vm0, %v661_v39 }
 0x135   : > { %v883_v40 = vld [vmem:[#allocation5] sm:$0xff] }
 0x136   : > { %886 = vperm.xlu0 %1406, %v883_v40  }
 0x164   : > { %v2049_v14 = vpop.f32.mrf.mxu1 }
 0x166   : > { %v1252_v19 = vpop.f32.mrf.mxu1 }
 0x188   : > { %v356_v41 = vpop.xlane.xlu1 %355 }
 0x189   : > { %1416 = vrcp.f32 %v356_v41 }
 0x18c   : > { %v704_v47 = vpop.xlane.xlu1 %703 }
 0x18d   : > { %v723_v48 = vadd.f32 %v704_v47, %v675_v42 }
 0x18f   : > { %739 = vst.msk [vmem:[#allocation6 + $0x60] sm:$0xff] %vm451_vm0, %v723_v48 }
 0x190   : > { %v700_v50 = vpop.xlane.xlu1 %699 }
 0x191   : > { %v721_v51 = vadd.f32 %v700_v50, %v673_v49 }
 0x193   : > { %737 = vst.msk [vmem:[#allocation6 + $0x50] sm:$0xff] %vm451_vm0, %v721_v51 }
 0x194   : > { %v696_v53 = vpop.xlane.xlu1 %695 }
 0x195   : > { %v719_v54 = vadd.f32 %v696_v53, %v671_v52 }
 0x196   : > { %v1417_v55 = vpop.eup %1416  ;;  %v758_v57 = vld [vmem:[#allocation6 + $0x60] sm:$0xff] }
 0x197   : > { %v358_v59 = vmul.f32 %v1417_v55, %v356_v41  ;;  %1295 = vmatpush3.xpose.msk.msra.mxu1 %vm451_vm0, %v758_v57  ;;  %735 = vst.msk [vmem:[#allocation6 + $0x40] sm:$0xff] %vm451_vm0, %v719_v54 }
 0x198   : > { %1296 = vmatprep.subr.mxu1 %v1628_v11  ;;  %v692_v61 = vpop.xlane.xlu1 %691 }
 0x199   : > { %v359_v62 = vsub.f32 2.0, %v358_v59  ;;  %v717_v63 = vadd.f32 %v692_v61, %v669_v58 }
 0x19a   : > { %v756_v12 = vld [vmem:[#allocation6 + $0x50] sm:$0xff] }
 0x19b   : > { %v360_v10 = vmul.f32 %v1417_v55, %v359_v62  ;;  %1297 = vmatpush3.xpose.msk.msra.mxu1 %vm451_vm0, %v757_v60  ;;  %733 = vst.msk [vmem:[#allocation6 + $0x30] sm:$0xff] %vm451_vm0, %v717_v63 }
 0x19c   : > { %1298 = vmatprep.subr.mxu1 %v1628_v11  ;;  %v688_v13 = vpop.xlane.xlu1 %687 }
 0x19d   : > { %v361_v15 = vmul.f32 %v2004_v56, %v360_v10  ;;  %v715_v16 = vadd.f32 %v688_v13, %v667_v0  ;;  %v663_v56 = vld [vmem:[#allocation6] sm:$0xff] }
 0x19f   : > { %1216 = vmatmul.mubr.f32.vlgmr.msra.gmra.mxu0 %v361_v15  ;;  %1299 = vmatpush3.xpose.msk.msra.mxu1 %vm451_vm0, %v756_v12  ;;  %731 = vst.msk [vmem:[#allocation6 + $0x20] sm:$0xff] %vm451_vm0, %v715_v16 }
 0x1a0   : > { %1254 = vmatpush3.xpose.msra.mxu0 %v1837_v1  ;;  %1300 = vmatprep.subr.mxu1 %v1628_v11  ;;  %v684_v21 = vpop.xlane.xlu1 %683  ;;  %v754_v1 = vld [vmem:[#allocation6 + $0x40] sm:$0xff] }
 0x1a1   : > { %1255 = vmatprep.subr.mxu0 %v1628_v11  ;;  %v713_v23 = vadd.f32 %v684_v21, %v665_v17  ;;  %1285 = vmatprep.mubr.msk.f32.mxu0 %vm1629_vm1, %v1628_v11 }
 0x1a2   : > { %v752_v30 = vld [vmem:[#allocation6 + $0x30] sm:$0xff] }
 0x1a3   : > { %1301 = vmatpush3.xpose.msk.msra.mxu1 %vm451_vm0, %v755_v20  ;;  %729 = vst.msk [vmem:[#allocation6 + $0x10] sm:$0xff] %vm451_vm0, %v713_v23 }
 0x1a4   : > { %1256 = vmatpush3.xpose.msra.mxu0 %v1840_v2  ;;  %1302 = vmatprep.subr.mxu1 %v1628_v11  ;;  %v680_v24 = vpop.xlane.xlu1 %679 }
 0x1a5   : > { %1257 = vmatprep.subr.mxu0 %v1628_v11  ;;  %v711_v25 = vadd.f32 %v680_v24, %v663_v56 }
 0x1a7   : > { %1303 = vmatpush3.xpose.msk.msra.mxu1 %vm451_vm0, %v754_v1  ;;  %727 = vst.msk [vmem:[#allocation6] sm:$0xff] %vm451_vm0, %v711_v25 }
 0x1a8   : > { %1258 = vmatpush3.xpose.msra.mxu0 %v1845_v3  ;;  %1304 = vmatprep.subr.mxu1 %v1628_v11  ;;  %v654_v29 = vpop.xlane.xlu1 %653  ;;  %v751_v3 = vld [vmem:[#allocation6 + $0x28] sm:$0xff] }
 0x1a9   : > { %1259 = vmatprep.subr.mxu0 %v1628_v11  ;;  %v655_v2 = vadd.f32 %v654_v29, %v652_v26 }
 0x1ab   : > { %1305 = vmatpush3.xpose.msk.msra.mxu1 %vm451_vm0, %v753_v28  ;;  %657 = vst.msk [vmem:[#allocation4] sm:$0xff] %vm451_vm0, %v655_v2 }
 0x1ac   : > { %1260 = vmatpush3.xpose.msra.mxu0 %v1929_v18  ;;  %1306 = vmatprep.subr.mxu1 %v1628_v11  ;;  %v750_v18 = vld [vmem:[#allocation6 + $0x20] sm:$0xff] }
 0x1ad   : > { %1261 = vmatprep.subr.mxu0 %v1628_v11 }
 0x1af   : > { %1307 = vmatpush3.xpose.msk.msra.mxu1 %vm451_vm0, %v752_v30 }
 0x1b0   : > { %1262 = vmatpush3.xpose.msra.mxu0 %v1849_v4  ;;  %1308 = vmatprep.subr.mxu1 %v1628_v11  ;;  %v749_v4 = vld [vmem:[#allocation6 + $0x18] sm:$0xff] }
 0x1b1   : > { %1263 = vmatprep.subr.mxu0 %v1628_v11  ;;  %v887_v34 = vpop.permute.xlu0 %886 }
 0x1b2   : > { %v901_v31 = vld [vmem:[#allocation4] sm:$0xff] }
 0x1b3   : > { %1309 = vmatpush3.xpose.msk.msra.mxu1 %vm451_vm0, %v751_v3  ;;  %v902_v32 = vmul.f32 0.0078125, %v901_v31 }
 0x1b4   : > { %1264 = vmatpush3.xpose.msra.mxu0 %v1940_v22  ;;  %1310 = vmatprep.subr.mxu1 %v1628_v11  ;;  %v748_v22 = vld [vmem:[#allocation6 + $0x10] sm:$0xff] }
 0x1b5   : > { %1265 = vmatprep.subr.mxu0 %v1628_v11  ;;  %905 = vperm.xlu1 %1407, %v902_v32  }
 0x1b7   : > { %1311 = vmatpush3.xpose.msk.msra.mxu1 %vm451_vm0, %v750_v18 }
 0x1b8   : > { %1266 = vmatpush3.xpose.msra.mxu0 %v1853_v5  ;;  %1312 = vmatprep.subr.mxu1 %v1628_v11  ;;  %v747_v5 = vld [vmem:[#allocation6 + $0x8] sm:$0xff] }
 0x1b9   : > { %1267 = vmatprep.subr.mxu0 %v1628_v11 }
 0x1bb   : > { %1313 = vmatpush3.xpose.msk.msra.mxu1 %vm451_vm0, %v749_v4 }
 0x1bc   : > { %1268 = vmatpush3.xpose.msra.mxu0 %v1951_v27  ;;  %1314 = vmatprep.subr.mxu1 %v1628_v11  ;;  %v746_v27 = vld [vmem:[#allocation6] sm:$0xff] }
 0x1bd   : > { %1269 = vmatprep.subr.mxu0 %v1628_v11 }
 0x1bf   : > { %1315 = vmatpush3.xpose.msk.msra.mxu1 %vm451_vm0, %v748_v22 }
 0x1c0   : > { %1270 = vmatpush3.xpose.msra.mxu0 %v1857_v6  ;;  %1316 = vmatprep.subr.mxu1 %v1628_v11  ;;  %v1631_v6 = vmov 1.0  }
 0x1c1   : > { %1271 = vmatprep.subr.mxu0 %v1628_v11 }
 0x1c3   : > { %1317 = vmatpush3.xpose.msk.msra.mxu1 %vm451_vm0, %v747_v5 }
 0x1c4   : > { %1272 = vmatpush3.xpose.msra.mxu0 %v1963_v35  ;;  %1318 = vmatprep.subr.mxu1 %v1628_v11  ;;  %v576_v35 = vmul.f32 -0.0078125, %v2049_v14 }
 0x1c5   : > { %1273 = vmatprep.subr.mxu0 %v1628_v11 }
 0x1c7   : > { %1319 = vmatpush3.xpose.msk.msra.mxu1 %vm451_vm0, %v746_v27 }
 0x1c8   : > { %1274 = vmatpush3.xpose.msra.mxu0 %v1861_v7 }
 0x1c9   : > { %1275 = vmatprep.subr.mxu0 %v1628_v11 }
 0x1ca   : > { %1321 = vmatmul.mubr.msk.f32.vlgmr.msra.gmra.mxu1 %vm451_vm0, %v1631_v6 }
 0x1cc   : > { %1276 = vmatpush3.xpose.msra.mxu0 %v1978_v43 }
 0x1cd   : > { %1277 = vmatprep.subr.mxu0 %v1628_v11 }
 0x1d0   : > { %1278 = vmatpush3.xpose.msra.mxu0 %v1865_v8 }
 0x1d1   : > { %1279 = vmatprep.subr.mxu0 %v1628_v11 }
 0x1d4   : > { %1280 = vmatpush3.xpose.msra.mxu0 %v1986_v44 }
 0x1d5   : > { %1281 = vmatprep.subr.mxu0 %v1628_v11 }
 0x1d8   : > { %1282 = vmatpush3.xpose.msra.mxu0 %v1869_v9 }
 0x1d9   : > { %1283 = vmatprep.subr.mxu0 %v1628_v11 }
 0x1dc   : > { %1284 = vmatpush3.xpose.msra.mxu0 %v1996_v46 }
 0x1df   : > { %1286 = vmatmul.mubr.f32.vlgmr.msra.gmra.mxu0 %v1991_v45 }
 0x230   : > { %v906_v47 = vpop.permute.xlu1 %905 }
 0x25f   : > { %v444_v7 = vpop.f32.mrf.mxu0 }
 0x260   : > { %v448_v43 = vmul.f32 -1.0, %v444_v7 }
 0x261   : > { %v1217_v33 = vpop.f32.mrf.mxu0 }
 0x262   : > { %v577_v8 = vadd.f32 %v576_v35, %v448_v43 }
 0x264   : > { %v908_v49 = vadd.f32 %v906_v47, %v577_v8 }
 0x28a   : > { %v879_v36 = vpop.f32.mrf.mxu1 }
 0x28b   : > { %v889_v44 = vadd.f32 %v887_v34, %v879_v36 }
 0x28c   : > { %v1322_v37 = vpop.f32.mrf.mxu1 }
 0x28d   : > { %v890_v38 = vadd.f32 1.0, %v889_v44 }
 0x28f   : > { %1418 = vrcp.f32 %v890_v38 }
 0x29c   : > { %v1419_v9 = vpop.eup %1418 }
 0x29d   : > { %v895_v11 = vmul.f32 %v1419_v9, %v890_v38 }
 0x29f   : > { %v896_v39 = vsub.f32 2.0, %v895_v11  ;;  %v646_v46 = vpop.f32.mrf.mxu0 }
 0x2a0   : > { %v892_v45 = vmul.f32 2.0, %v646_v46 }
 0x2a1   : > { %v897_v40 = vmul.f32 %v1419_v9, %v896_v39  ;;  %v1287_v41 = vpop.f32.mrf.mxu0 }
 0x2a2   : > { %v893_v42 = vadd.f32 1.0, %v892_v45 }
 0x2a4   : > { %v898_v48 = vmul.f32 %v897_v40, %v893_v42 }
 0x2a6   : > { %v899_v50 = vsub.f32 1.0, %v898_v48 }
 0x2a8   : > { %v909_v51 = vadd.f32 %v908_v49, %v899_v50 }
 0x2aa   : > { %910 = vst [vmem:[%s344_s27] sm:$0xff] %v909_v51 }
 0x2ab   : > { %1545 = shalt.err (!%p1542_p2)
}
 0x2ac   : > { %s1546_s6 = scalar_lea.hbm %s923_s13, 128  ;;  %s1550_s8 = scalar_lea.hbm %s2158_s4, 256 }
 0x2ad   : > { %p1547_p4 = scmp.ne.s32.totalorder %s923_s13, %s1546_s6  ;;  %p1551_p6 = scmp.lt.s32.totalorder %s923_s13, %s2158_s4 }
 0x2ae   : > { %p1552_p10 = scmp.lt.s32.totalorder %s1550_s8, %s1546_s6 }
 0x2af   : > { %p1548_p5 = pnand %p1547_p4, %p1713_p9 }
 0x2b0   : > { %p1553_p8 = por %p1552_p10, %p1551_p6 }
 0x2b1   : > { %p1549_p7 = pneg %p1548_p5 }
 0x2b3   : > { %p1554_p0 = pnand %p1553_p8, %p1549_p7 }
 0x2b5   : > { %1557 = shalt.err (!%p1554_p0)
}
 0x2b6   : > { %1331 = dma.vmem_to_hbm [thread:$0]  (%p1713_p9), %s926_s1, 128, %s923_s13, %s912_s17  }
 0x2b7 PF: > { %s937_s26 = sand.u32 1, %s1600_s15   ;;  %p2180_p1 = scmp.ge.s32.totalorder %s1620_s20, 2 }
 0x2b8   : > { %s938_s12 = scalar_lea.sflag [#allocation9], %s937_s26 }
 0x2b9   : > { %p1347_p3 = pnand %p2180_p1, %p1720_p11 }
 0x2bb   : > { %p1348_p13 = pneg %p1347_p3 }
 0x2bd   : > { %1595 = dma.done.wait (%p1348_p13), %s938_s12, 128  }
 0x2be   : > { %1597 = vsyncadd (%p1348_p13), %s938_s12, 4294967168  ;;  %s26_s20 = sadd.s32 1, %s1620_s20   ;;  %s2181_s14 = sld [smem:[#allocation20_spill]] }
 0x2bf   : > { %p23_p12 = scmp.ge.s32.totalorder %s26_s20, 4   ;;  %s2182_s17 = sld [smem:[#allocation22_spill]] }
 0x2c0   : > { %s2183_s28 = sld [smem:[#allocation21_spill]]  ;;  %s2184_s15 = smov %s1604_s16 }
 0x2c1   : > { %s2186_s18 = smov %s1616_s19 }
 0x2c2   :  { %25 = sbr.rel (!%p23_p12) target bundleno = 12 (0xc), region = 126 }
 0x2c4   : > { %s2185_s16 = smov %s2181_s14 }
 0x2c6   : > { %s2187_s19 = smov %s2183_s28 }
 0x2c7   :  { %943 = vsyncpa [#allocation8], 1 }
 0x2c8   :  { %945 = vsyncpa [#allocation8 + $0x1], 1 }
 0x2c9   :  { %946 = vsyncpa [#allocation11], 1 }
 0x2ca   :  { %948 = vsyncpa [#allocation11 + $0x1], 1 }
 0x2cb   :  { %949 = vsyncpa [#allocation14], 1 }
 0x2cc   :  { %951 = vsyncpa [#allocation14 + $0x1], 1 }
 0x2cd   :  { %952 = vsyncpa [#allocation9], 1 }
 0x2ce   :  { %954 = vsyncpa [#allocation9 + $0x1], 1 }

</bundles_post_ra>
